<compile_context>
chip_gen: v5e
topology: v5e:2x2
jax: 0.10.0
libtpu: 0.0.40
codegen_flags: <defaults>
</compile_context>

<pallas_src>
import functools

import jax
import jax.numpy as jnp
import numpy as np
from jax.experimental import pallas as pl
from jax.experimental.pallas import tpu as pltpu


# ---------------------------------------------------------------------------
# Kernels
# ---------------------------------------------------------------------------
def _cfg_blend_kernel(c_in_ref, x_ref, bias_ref, wmix_ref, mask_ref, x0_ref, o_ref):
    """Masked variant. One (batch, HW-tile) block per grid step.

    c_in_ref : (B,)        SMEM  precomputed rsqrt(sigma^2 + 1)
    x_ref    : (1, C, T)   VMEM
    bias_ref : (1, C, 1)   VMEM  CFG-folded conditioning bias
    wmix_ref : (C, C)      VMEM  channel-mixing (1x1 conv) weights
    mask_ref : (1, 1, T)   VMEM
    x0_ref   : (1, C, T)   VMEM
    o_ref    : (1, C, T)   VMEM
    """
    b = pl.program_id(0)
    xs = x_ref[0] * c_in_ref[b]                                        # (C, T)
    h = jnp.dot(wmix_ref[...], xs, preferred_element_type=jnp.float32) # (C, T)
    denoised = h + bias_ref[0]                                         # (C,1) lane-broadcast
    m = mask_ref[0]                                                    # (1, T)
    o_ref[0] = (x0_ref[0] * (1.0 - m) + m * denoised).astype(o_ref.dtype)


def _cfg_nomask_kernel(c_in_ref, x_ref, bias_ref, wmix_ref, o_ref):
    """mask=None variant: no blend, no fake mask/x0 HBM traffic."""
    b = pl.program_id(0)
    xs = x_ref[0] * c_in_ref[b]
    h = jnp.dot(wmix_ref[...], xs, preferred_element_type=jnp.float32)
    o_ref[0] = (h + bias_ref[0]).astype(o_ref.dtype)


# ---------------------------------------------------------------------------
# Wrapper
# ---------------------------------------------------------------------------
def _pick_tile_hw(hw):
    for t in (2048, 1024, 512, 256, 128):
        if hw % t == 0:
            return t
    return hw  # full-extent block (exempt from the 128-divisibility rule)


def cfg_masked_denoise(x, sigma, uncond, cond, cond_scale, mask, x0, xi, wmix, wc):
    """JAX wrapper mirroring CFGMaskedDenoiser.forward (xi is unused, as in PyTorch)."""
    del xi
    B, C, H, W = x.shape
    HW = H * W
    D = uncond.shape[-1]

    x_r = x.reshape(B, C, HW).astype(jnp.float32)
    sigma_r = sigma.reshape(B).astype(jnp.float32)
    c_in = jax.lax.rsqrt(sigma_r * sigma_r + 1.0)                      # (B,)

    # --- CFG fold (exact algebra):
    #   u = h + Wc@emb_u ; c = h + Wc@emb_c ; u + (c-u)*s = h + Wc@(emb_u + (emb_c-emb_u)*s)
    emb_u = uncond.reshape(B, D).astype(jnp.float32)
    emb_c = cond.reshape(B, D).astype(jnp.float32)
    emb_cfg = emb_u + (emb_c - emb_u) * cond_scale                     # works for traced cond_scale
    bias = jnp.einsum("bd,cd->bc", emb_cfg, wc.astype(jnp.float32),
                      precision=jax.lax.Precision.HIGHEST)             # (B, C), tiny, outside grid
    bias_r = bias.reshape(B, C, 1)

    tile = _pick_tile_hw(HW)
    n_tiles = HW // tile
    grid = (B, n_tiles)

    wmix_f = wmix.astype(jnp.float32)

    compiler_params = pltpu.CompilerParams(
        dimension_semantics=("parallel", "parallel"),
        vmem_limit_bytes=32 * 1024 * 1024,  # tiles are tiny; explicit & portable (v7x 64 MiB VMEM)
    )

    common_in_specs = [
        pl.BlockSpec(memory_space=pltpu.MemorySpace.SMEM),             # c_in (whole array)
        pl.BlockSpec((1, C, tile), lambda b, t: (b, 0, t)),            # x
        pl.BlockSpec((1, C, 1), lambda b, t: (b, 0, 0)),               # bias
        pl.BlockSpec((C, C), lambda b, t: (0, 0)),                     # Wmix (fetched once)
    ]
    out_spec = pl.BlockSpec((1, C, tile), lambda b, t: (b, 0, t))
    out_shape = jax.ShapeDtypeStruct((B, C, HW), jnp.float32)

    if mask is None:
        out = pl.pallas_call(
            _cfg_nomask_kernel,
            out_shape=out_shape,
            grid=grid,
            in_specs=common_in_specs,
            out_specs=out_spec,
            compiler_params=compiler_params,
        )(c_in, x_r, bias_r, wmix_f)
        return out.reshape(B, C, H, W)

    # Masked path. Keep the mask at its native batch extent (1 or B); no broadcast in HBM.
    mask_r = jnp.asarray(mask, jnp.float32).reshape(-1, 1, HW)
    Bm = mask_r.shape[0]
    assert Bm in (1, B), f"mask batch dim {Bm} incompatible with x batch {B}"
    if Bm == B:
        mask_idx = lambda b, t: (b, 0, t)
    else:
        mask_idx = lambda b, t: (0, 0, t)
    x0_r = x0.reshape(B, C, HW).astype(jnp.float32)

    out = pl.pallas_call(
        _cfg_blend_kernel,
        out_shape=out_shape,
        grid=grid,
        in_specs=common_in_specs + [
            pl.BlockSpec((1, 1, tile), mask_idx),                      # mask
            pl.BlockSpec((1, C, tile), lambda b, t: (b, 0, t)),        # x0
        ],
        out_specs=out_spec,
        compiler_params=compiler_params,
    )(c_in, x_r, bias_r, wmix_f, mask_r, x0_r)
    return out.reshape(B, C, H, W)


# ---------------------------------------------------------------------------
# Pure-JAX reference (mirrors the PyTorch forward line by line)
# ---------------------------------------------------------------------------
def _inner_model_ref(x, sigma, emb, wmix, wc):
    c_in = 1.0 / jnp.sqrt(sigma ** 2 + 1.0)
    xs = x * c_in[:, None, None, None]
    h = jnp.einsum("ck,bkhw->bchw", wmix, xs, precision=jax.lax.Precision.HIGHEST)
    bias = jnp.einsum("cd,bd->bc", wc, emb, precision=jax.lax.Precision.HIGHEST)
    return h + bias[:, :, None, None]


def _cfg_masked_ref(x, sigma, uncond, cond, cond_scale, mask, x0, wmix, wc):
    x_in = jnp.concatenate([x] * 2)
    sigma_in = jnp.concatenate([sigma] * 2)
    cond_in = jnp.concatenate([uncond, cond])
    out = _inner_model_ref(x_in, sigma_in, cond_in, wmix, wc)
    u, c = jnp.split(out, 2, axis=0)
    denoised = u + (c - u) * cond_scale
    if mask is not None:
        denoised = x0 * (1.0 - mask) + mask * denoised
    return denoised


if __name__ == "__main__":
    B, C, H, W, D = 2, 4, 16, 16, 32
    cond_scale = 7.5

    key = jax.random.PRNGKey(0)
    k_x, k_sig, k_u, k_c, k_m, k_x0, k_wm, k_wc = jax.random.split(key, 8)

    x = jax.random.normal(k_x, (B, C, H, W), jnp.float32)
    sigma = jax.random.uniform(k_sig, (B,), jnp.float32, 0.5, 5.0)
    uncond = jax.random.normal(k_u, (B, D), jnp.float32)
    cond = jax.random.normal(k_c, (B, D), jnp.float32)
    mask = (jax.random.uniform(k_m, (B, 1, H, W)) > 0.5).astype(jnp.float32)
    x0 = jax.random.normal(k_x0, (B, C, H, W), jnp.float32)

    # Deterministic synthetic "inner model" parameters.
    wmix = jax.random.normal(k_wm, (C, C), jnp.float32) / jnp.sqrt(C)
    wc = jax.random.normal(k_wc, (C, D), jnp.float32) / jnp.sqrt(D)

    # Masked path
    out = cfg_masked_denoise(x, sigma, uncond, cond, cond_scale, mask, x0, None, wmix, wc)
    out = jax.block_until_ready(out)
    ref = _cfg_masked_ref(x, sigma, uncond, cond, cond_scale, mask, x0, wmix, wc)
    np.testing.assert_allclose(np.asarray(out), np.asarray(ref), rtol=1e-3, atol=1e-3)

    # mask=None path (specialized kernel, no blend / no fake traffic)
    out_nm = cfg_masked_denoise(x, sigma, uncond, cond, cond_scale, None, None, None, wmix, wc)
    out_nm = jax.block_until_ready(out_nm)
    ref_nm = _cfg_masked_ref(x, sigma, uncond, cond, cond_scale, None, None, wmix, wc)
    np.testing.assert_allclose(np.asarray(out_nm), np.asarray(ref_nm), rtol=1e-3, atol=1e-3)

    print("KERNEL_OK")
</pallas_src>

<mosaic_0001>
module attributes {stable_mosaic.version = 11 : i64} {
  func.func @_cfg_blend_kernel(%arg0: i32, %arg1: i32, %arg2: memref<2xf32, #tpu.memory_space<smem>>, %arg3: memref<1x4x256xf32, #tpu.memory_space<vmem>>, %arg4: memref<1x4x1xf32, #tpu.memory_space<vmem>>, %arg5: memref<4x4xf32, #tpu.memory_space<vmem>>, %arg6: memref<1x1x256xf32, #tpu.memory_space<vmem>>, %arg7: memref<1x4x256xf32, #tpu.memory_space<vmem>>, %arg8: memref<1x4x256xf32, #tpu.memory_space<vmem>>) attributes {dimension_semantics = [#tpu.dimension_semantics<parallel>, #tpu.dimension_semantics<parallel>], iteration_bounds = array<i64: 2, 1>, scalar_prefetch = 0 : i64, scratch_operands = 0 : i64, tpu.core_type = #tpu.core_type<tc>, window_params = [{transform_indices = @transform_0, window_bounds = array<i64: 2>}, {transform_indices = @transform_1, window_bounds = array<i64: 1, 4, 256>}, {transform_indices = @transform_2, window_bounds = array<i64: 1, 4, 1>}, {pipeline_mode = #tpu.pipeline_mode<synchronous>, transform_indices = @transform_3, window_bounds = array<i64: 4, 4>}, {transform_indices = @transform_4, window_bounds = array<i64: 1, 1, 256>}, {transform_indices = @transform_5, window_bounds = array<i64: 1, 4, 256>}, {transform_indices = @transform_6, window_bounds = array<i64: 1, 4, 256>}]} {
    %c0 = arith.constant 0 : index
    %c0_0 = arith.constant 0 : index
    %c0_1 = arith.constant 0 : index
    %0 = vector.load %arg3[%c0, %c0_0, %c0_1] : memref<1x4x256xf32, #tpu.memory_space<vmem>>, vector<1x4x256xf32>
    %1 = vector.shape_cast %0 : vector<1x4x256xf32> to vector<4x256xf32>
    %2 = arith.index_cast %arg0 : i32 to index
    %3 = memref.load %arg2[%2] : memref<2xf32, #tpu.memory_space<smem>>
    %4 = vector.broadcast %3 : f32 to vector<4x256xf32>
    %5 = arith.mulf %1, %4 : vector<4x256xf32>
    %c0_2 = arith.constant 0 : index
    %c0_3 = arith.constant 0 : index
    %6 = vector.load %arg5[%c0_2, %c0_3] : memref<4x4xf32, #tpu.memory_space<vmem>>, vector<4x4xf32>
    %cst = arith.constant dense<0.000000e+00> : vector<4x256xf32>
    %7 = tpu.matmul %6, %5, %cst {dimension_numbers = #tpu.dot_dimension_numbers<[1], [0], [0], [1], [0, 0, 1, 1], [], []>} : vector<4x4xf32>, vector<4x256xf32>, vector<4x256xf32> -> vector<4x256xf32>
    %c0_4 = arith.constant 0 : index
    %c0_5 = arith.constant 0 : index
    %c0_6 = arith.constant 0 : index
    %8 = vector.load %arg4[%c0_4, %c0_5, %c0_6] : memref<1x4x1xf32, #tpu.memory_space<vmem>>, vector<1x4x1xf32>
    %9 = vector.shape_cast %8 : vector<1x4x1xf32> to vector<4x1xf32>
    %10 = vector.broadcast %9 : vector<4x1xf32> to vector<4x256xf32>
    %11 = arith.addf %7, %10 : vector<4x256xf32>
    %c0_7 = arith.constant 0 : index
    %c0_8 = arith.constant 0 : index
    %c0_9 = arith.constant 0 : index
    %12 = vector.load %arg6[%c0_7, %c0_8, %c0_9] : memref<1x1x256xf32, #tpu.memory_space<vmem>>, vector<1x1x256xf32>
    %13 = vector.shape_cast %12 : vector<1x1x256xf32> to vector<1x256xf32>
    %c0_10 = arith.constant 0 : index
    %c0_11 = arith.constant 0 : index
    %c0_12 = arith.constant 0 : index
    %14 = vector.load %arg7[%c0_10, %c0_11, %c0_12] : memref<1x4x256xf32, #tpu.memory_space<vmem>>, vector<1x4x256xf32>
    %15 = vector.shape_cast %14 : vector<1x4x256xf32> to vector<4x256xf32>
    %cst_13 = arith.constant 1.000000e+00 : f32
    %16 = vector.broadcast %cst_13 : f32 to vector<1x256xf32>
    %17 = arith.subf %16, %13 : vector<1x256xf32>
    %18 = vector.broadcast %17 : vector<1x256xf32> to vector<4x256xf32>
    %19 = arith.mulf %15, %18 : vector<4x256xf32>
    %20 = vector.broadcast %13 : vector<1x256xf32> to vector<4x256xf32>
    %21 = arith.mulf %20, %11 : vector<4x256xf32>
    %22 = arith.addf %19, %21 : vector<4x256xf32>
    %c0_14 = arith.constant 0 : index
    %c0_15 = arith.constant 0 : index
    %c0_16 = arith.constant 0 : index
    %23 = vector.load %arg8[%c0_14, %c0_15, %c0_16] : memref<1x4x256xf32, #tpu.memory_space<vmem>>, vector<1x4x256xf32>
    %24 = vector.shape_cast %23 : vector<1x4x256xf32> to vector<4x256xf32>
    %25 = vector.shape_cast %22 : vector<4x256xf32> to vector<1x4x256xf32>
    tpu.vector_store %arg8[%c0_14, %c0_15, %c0_16], %25 {strides = array<i32>} : memref<1x4x256xf32, #tpu.memory_space<vmem>>, vector<1x4x256xf32>,
    return
  }
  func.func @transform_0(%arg0: i32, %arg1: i32) -> i32 {
    %c0_i32 = arith.constant 0 : i32
    %c0_i32_0 = arith.constant 0 : i32
    return %c0_i32 : i32
  }
  func.func @transform_1(%arg0: i32, %arg1: i32) -> (i32, i32, i32) {
    %c0_i32 = arith.constant 0 : i32
    %c0_i32_0 = arith.constant 0 : i32
    return %arg0, %c0_i32, %arg1 : i32, i32, i32
  }
  func.func @transform_2(%arg0: i32, %arg1: i32) -> (i32, i32, i32) {
    %c0_i32 = arith.constant 0 : i32
    %c0_i32_0 = arith.constant 0 : i32
    %c0_i32_1 = arith.constant 0 : i32
    return %arg0, %c0_i32, %c0_i32_0 : i32, i32, i32
  }
  func.func @transform_3(%arg0: i32, %arg1: i32) -> (i32, i32) {
    %c0_i32 = arith.constant 0 : i32
    %c0_i32_0 = arith.constant 0 : i32
    %c0_i32_1 = arith.constant 0 : i32
    return %c0_i32, %c0_i32_0 : i32, i32
  }
  func.func @transform_4(%arg0: i32, %arg1: i32) -> (i32, i32, i32) {
    %c0_i32 = arith.constant 0 : i32
    %c0_i32_0 = arith.constant 0 : i32
    return %arg0, %c0_i32, %arg1 : i32, i32, i32
  }
  func.func @transform_5(%arg0: i32, %arg1: i32) -> (i32, i32, i32) {
    %c0_i32 = arith.constant 0 : i32
    %c0_i32_0 = arith.constant 0 : i32
    return %arg0, %c0_i32, %arg1 : i32, i32, i32
  }
  func.func @transform_6(%arg0: i32, %arg1: i32) -> (i32, i32, i32) {
    %c0_i32 = arith.constant 0 : i32
    %c0_i32_0 = arith.constant 0 : i32
    return %arg0, %c0_i32, %arg1 : i32, i32, i32
  }
}

</mosaic_0001>

<bundles_post_ra>
// kernel: tpu_custom_call.1
= control target key start
LH: loop header
LB: loop body
LE: loop exit
PB: predicated region body
PF: predicated region fallthrough
CT: control target
= control target key end

     0   :  { %s1145_s0 = inlined_call_operand.vmem [shape: f32[2], index: 0, kind: input, shape index: {}]   ;;  %s1146_s1 = inlined_call_operand.hbm [shape: f32[2,4,256], index: 1, kind: input, shape index: {}]   ;;  %s1147_s2 = inlined_call_operand.vmem [shape: f32[2,4,1], index: 2, kind: input, shape index: {}]   ;;  %s1148_s3 = inlined_call_operand.vmem [shape: f32[4,4], index: 3, kind: input, shape index: {}]   ;;  %s1149_s4 = inlined_call_operand.vmem [shape: f32[2,1,256], index: 4, kind: input, shape index: {}]   ;;  %s1150_s5 = inlined_call_operand.hbm [shape: f32[2,4,256], index: 5, kind: input, shape index: {}]   ;;  %s1151_s6 = inlined_call_operand.hbm [shape: f32[2,4,256], index: 6, kind: output, shape index: {}]  }
   0x1   :  { %1155 = sst [smem:[#allocation18_spill]] %s1145_s0 }
   0x2   :  { %11 = vsyncpa [#allocation5], 0 }
   0x3   :  { %12 = vsyncpa [#allocation3], 0 }
   0x4   :  { %14 = vsyncpa [#allocation3 + $0x1], 0 }
   0x5   :  { %15 = vsyncpa [#allocation8], 0 }
   0x6   :  { %17 = vsyncpa [#allocation8 + $0x1], 0 }
   0x7   :  { %18 = vsyncpa [#allocation4], 0 }
   0x8   :  { %20 = vsyncpa [#allocation4 + $0x1], 0  ;;  %s969_s21 = smov 0   ;;  %s971_s22 = smov 0  }
   0x9   :  { %s973_s23 = smov 0   ;;  %s975_s24 = smov 0  }
   0xa   :  { %s977_s25 = smov 0   ;;  %s979_s26 = smov 0  }
   0xb LB: > { %1156 = sst [smem:[#allocation14_spill]] %s926_s25  ;;  %s655_s27 = sadd.s32 4294967295, %s930_s26   ;;  %s930_s26 = sphi %s979_s26, %s26_s26   ;;  %s926_s25 = sphi %s977_s25, %s1171_s25   ;;  %s922_s24 = sphi %s975_s24, %s1170_s24   ;;  %s918_s23 = sphi %s973_s23, %s1174_s23   ;;  %s914_s22 = sphi %s971_s22, %s1173_s22   ;;  %s910_s21 = sphi %s969_s21, %s1172_s21  }
   0xc   : > { %s656_s28 = sadd.s32 4294967294, %s930_s26   ;;  %p81_p0 = scmp.ne.s32.totalorder %s914_s22, %s910_s21 }
   0xd   : > { %p1003_p1 = scmp.eq.s32.totalorder %s655_s27, 0  ;;  %p1007_p2 = scmp.eq.s32.totalorder %s655_s27, 1 }
   0xe   : > { %p216_p3 = scmp.eq.s32.totalorder %s656_s28, 1  ;;  %p657_p5 = scmp.ge.s32.totalorder %s930_s26, 1 }
   0xf   : > { %p1013_p4 = por %p1003_p1, %p81_p0  ;;  %p223_p7 = scmp.lt.s32.totalorder %s930_s26, 3 }
  0x10   : > { %p1018_p6 = por %p216_p3, %p81_p0  ;;  %s1162_s0 = sld [smem:[#allocation18_spill]] }
  0x11   : > { %p1026_p8 = pnand %p657_p5, %p223_p7  ;;  %s38_s13 = sadd.s32 1, %s926_s25 }
  0x12   : > { %s1160_s8 = scalar_select %p1018_p6, 1, 0 }
  0x13   : > { %p695_p10 = pneg %p1026_p8  ;;  %s68_s14 = sadd.s32 1, %s918_s23 }
  0x14   : > { %1161 = sst [smem:[#allocation15_spill]] %s1160_s8  ;;  %p40_p12 = scmp.ge.s32.totalorder %s38_s13, 2 }
  0x15   : > { %p696_p11 = pnand %p695_p10, %p1003_p1  ;;  %s932_s15 = smov [#allocation2]  }
  0x16   : > { %s235_s11 = sshll.u32 %s1162_s0, 4  ;;  %s1176_s13 = smov (%p40_p12, %s38_s13), 0  ;;  %s236_s11 = int_to_ptr.vmem [resolvable:$true] %s235_s11 }
  0x17   : > { %698 = dma.vmem_to_smem (!%p696_p11), %s236_s11, 16, %s932_s15, [#allocation5]  }
  0x18   : > { %1164 = sst [smem:[#allocation16_spill]] %s1176_s13  ;;  %p75_p13 = scmp.ne.s32.totalorder %s918_s23, %s914_s22 }
  0x19   : > { %p76_p0 = scmp.eq.s32.totalorder %s930_s26, 0  ;;  %s63_s16 = ssub.s32 %s926_s25, %s1176_s13 }
  0x1a   : > { %p711_p3 = scmp.lt.s32.totalorder %s930_s26, 2  ;;  %p66_p5 = scmp.eq.s32.totalorder %s63_s16, 0 }
  0x1b   : > { %p77_p7 = por %p76_p0, %p75_p13  ;;  %p1047_p9 = por %p1007_p2, %p75_p13 }
  0x1c   : > { %s249_s18 = sand.u32 1, %s918_s23   ;;  %s682_s27 = sshll.u32 %s926_s25, 3 }
  0x1d   : > { %s1053_s19 = scalar_select %p66_p5, %s918_s23, %s68_s14  }
  0x1e   : > { %s660_s20 = sshll.u32 %s249_s18, 3  ;;  %s260_s10 = scalar_lea.hbm %s1146_s1, %s682_s27 }
  0x1f   : > { %1166 = sst [smem:[#allocation17_spill]] %s1053_s19  ;;  %s253_s11 = scalar_lea.vmem [#allocation6], %s660_s20 }
  0x20   : > { %s264_s15 = sshll.u32 %s253_s11, 4  ;;  %s262_s0 = sshll.u32 %s260_s10, 4  ;;  %s265_s15 = int_to_ptr.vmem [resolvable:$true] %s264_s15  ;;  %s263_s0 = int_to_ptr.hbm [resolvable:$true] %s262_s0 }
  0x21   : > { %p700_p10 = pnand %p711_p3, %p77_p7  ;;  %s301_s13 = scalar_lea.hbm %s1150_s5, %s682_s27 }
  0x22   : > { %s250_s8 = scalar_lea.sflag [#allocation3], %s249_s18  ;;  %s303_s14 = sshll.u32 %s301_s13, 4  ;;  %s304_s14 = int_to_ptr.hbm [resolvable:$true] %s303_s14 }
  0x23   : > { %702 = dma.hbm_to_vmem [thread:$0]  (!%p700_p10), %s263_s0, 128, %s265_s15, %s250_s8  }
  0x24   : > { %s294_s19 = scalar_lea.vmem [#allocation7], %s660_s20  ;;  %s291_s28 = scalar_lea.sflag [#allocation8], %s249_s18 }
  0x25   : > { %s305_s25 = sshll.u32 %s294_s19, 4  ;;  %314 = sbr.rel (%p1026_p8) target bundleno = 207 (0xcf), region = 44  ;;  %s306_s25 = int_to_ptr.vmem [resolvable:$true] %s305_s25 }
  0x26   : > { %705 = dma.hbm_to_vmem [thread:$0]  (!%p700_p10), %s304_s14, 128, %s306_s25, %s291_s28  }
  0x2a   : > { %893 = dma.done.wait (%p1003_p1), [#allocation5], 16  }
  0x2b   : > { %895 = vsyncadd (%p1003_p1), [#allocation5], 4294967280  ;;  %s1071_s27 = sand.u32 1, %s914_s22  }
  0x2c   : > { %s1074_s0 = sshll.u32 %s1071_s27, 3  ;;  %s322_s8 = scalar_lea.sflag [#allocation3], %s1071_s27 }
  0x2d   : > { %s325_s25 = scalar_lea.vmem [#allocation6], %s1074_s0 }
  0x2e   : > { %897 = dma.done.wait (%p1013_p4), %s322_s8, 128  }
  0x2f   : > { %899 = vsyncadd (%p1013_p4), %s322_s8, 4294967168  ;;  %s332_s29 = scalar_lea.sflag [#allocation8], %s1071_s27  ;;  %s335_s12 = scalar_lea.vmem [#allocation7], %s1074_s0 }
  0x30   : > { %901 = dma.done.wait (%p1013_p4), %s332_s29, 128  }
  0x31   : > { %903 = vsyncadd (%p1013_p4), %s332_s29, 4294967168 }
  0x32   : > { %341 = sfence }
  0x33   : > { %s400_s13 = sld [smem:[#allocation2 + %s922_s24]]  ;;  %p384_p1 = scmp.lt.s32.totalorder %s922_s24, 1  ;;  %v933_v0 = vmov 0   ;;  %v399_v1 = vld [vmem:[%s325_s25] sm:$0xff]  ;;  %vm418_vm0 = vcmask 1043456   ;;  %vm414_vm1 = vcmask 31744  }
  0x34   : > { %764 = vset.pattern.permute.xlu0 %v933_v0  ;;  %v403_v5 = vld [vmem:[%s1148_s3] sm:$0xf]  ;;  %s684_s28 = sshll.u32 %s922_s24, 3 }
  0x35   : > { %s385_s18 = scalar_select %p384_p1, %s922_s24, 1  ;;  %v464_v20 = vld [vmem:[%s335_s12] sm:$0xff] }
  0x36   : > { %s501_s29 = scalar_lea.hbm %s1151_s6, %s684_s28  ;;  %s382_s24 = scalar_lea.vmem [#allocation9], %s1074_s0 }
  0x37   : > { %s671_s19 = sshll.u32 %s385_s18, 2  ;;  %s672_s15 = sshll.u32 %s385_s18, 1 }
  0x38   : > { %s387_s10 = scalar_lea.vmem %s1147_s2, %s671_s19  ;;  %s395_s14 = scalar_lea.vmem %s1149_s4, %s672_s15 }
  0x39   : > { %v401_v2 = vstv %s400_s13  ;;  %v404_v4 = vld [vmem:[%s387_s10] sm:$0xf]  ;;  %s503_s13 = sshll.u32 %s382_s24, 4  ;;  %s505_s18 = sshll.u32 %s501_s29, 4  ;;  %s504_s13 = int_to_ptr.vmem [resolvable:$true] %s503_s13  ;;  %s506_s18 = int_to_ptr.hbm [resolvable:$true] %s505_s18 }
  0x3a   : > { %v402_v3 = vmul.f32 %v401_v2, %v399_v1  ;;  %407 = vperm.xlu0 %764, %v404_v4   ;;  %v463_v8 = vld [vmem:[%s395_s14] sm:$0x3]  ;;  %s488_s12 = scalar_lea.sflag [#allocation4], %s1071_s27  ;;  %s854_s19 = sshra.s32 %s506_s18, 4  ;;  %s855_s19 = int_to_ptr.hbm [resolvable:$true] %s854_s19 }
  0x3b   : > { %v465_v9 = vsub.f32 1.0, %v463_v8  ;;  %v475_v14 = vperm.slane %v463_v8, 1  ;;  %v474_v17 = vperm.slane %v463_v8, 0  ;;  %s856_s20 = scalar_lea.hbm %s855_s19, 8  ;;  %s860_s0 = scalar_lea.hbm %s1151_s6, 16 }
  0x3c   : > { %411 = vst [vmem:[#allocation1] ss:$2 sm:$0xff] %v402_v3  ;;  %p857_p2 = scmp.ne.s32.totalorder %s855_s19, %s856_s20  ;;  %p861_p11 = scmp.lt.s32.totalorder %s855_s19, %s1151_s6 }
  0x3d   : > { %v468_v10 = vperm.slane %v465_v9, 1  ;;  %v467_v11 = vperm.slane %v465_v9, 0  ;;  %p862_p12 = scmp.lt.s32.totalorder %s860_s0, %s856_s20 }
  0x3e   : > { %p858_p4 = pnand %p857_p2, %p1047_p9 }
  0x3f   : > { %v469_v12 = vrot.slane %v468_v10, 4  ;;  %p863_p13 = por %p862_p12, %p861_p11 }
  0x40   : > { %p859_p8 = pneg %p858_p4 }
  0x41   : > { %v470_v21 = vsel %vm418_vm0, %v467_v11, %v469_v12 }
  0x42   : > { %v472_v23 = vmul.f32 %v470_v21, %v464_v20  ;;  %p864_p0 = pnand %p863_p13, %p859_p8 }
  0x43   : > { %v412_v6 = vld.sshfl [vmem:[#allocation1] sm:$0xff pattern:$0x75316420]  ;;  %v413_v7 = vld.sshfl [vmem:[#allocation1 + $0x8] sm:$0xff pattern:$0x75316420] }
  0x44   : > { %673 = vmatpush.msk.msra.mxu0 %vm418_vm0, %v412_v6  ;;  %675 = vmatpush.msk.msra.mxu1 %vm418_vm0, %v413_v7 }
  0x45   : > { %674 = vmatmul.msk.f32.vlgmr.msra.gmra.mxu0 %vm414_vm1, %v403_v5  ;;  %676 = vmatmul.msk.f32.vlgmr.msra.gmra.mxu1 %vm414_vm1, %v403_v5 }
  0xac   : > { %v408_v13 = vpop.permute.xlu0 %407 }
  0xc2   : > { %v440_v15 = vpop.f32.mrf.mxu0  ;;  %v460_v16 = vpop.f32.mrf.mxu1 }
  0xc3   : > { %v441_v18 = vadd.f32 %v440_v15, %v408_v13  ;;  %v461_v19 = vadd.f32 %v460_v16, %v408_v13 }
  0xc5   : > { %v479_v22 = vmul.f32 %v475_v14, %v461_v19  ;;  %v478_v24 = vmul.f32 %v474_v17, %v441_v18 }
  0xc7   : > { %v482_v25 = vrot.slane %v479_v22, 4 }
  0xc9   : > { %v483_v26 = vsel %vm418_vm0, %v478_v24, %v482_v25 }
  0xca   : > { %v485_v27 = vadd.f32 %v483_v26, %v472_v23 }
  0xcc   : > { %486 = vst [vmem:[%s382_s24] sm:$0xff] %v485_v27 }
  0xcd   : > { %867 = shalt.err (!%p864_p0)
}
  0xce   : > { %693 = dma.vmem_to_hbm [thread:$0]  (%p1047_p9), %s504_s13, 128, %s506_s18, %s488_s12  }
  0xcf PF: > { %s517_s15 = sand.u32 1, %s910_s21   ;;  %p1168_p3 = scmp.ge.s32.totalorder %s930_s26, 2 }
  0xd0   : > { %s518_s30 = scalar_lea.sflag [#allocation4], %s517_s15 }
  0xd1   : > { %p707_p5 = pnand %p1168_p3, %p1018_p6 }
  0xd3   : > { %p708_p7 = pneg %p707_p5 }
  0xd5   : > { %905 = dma.done.wait (%p708_p7), %s518_s30, 128  }
  0xd6   : > { %907 = vsyncadd (%p708_p7), %s518_s30, 4294967168  ;;  %s26_s26 = sadd.s32 1, %s930_s26   ;;  %s1169_s16 = sld [smem:[#allocation17_spill]] }
  0xd7   : > { %p23_p10 = scmp.ge.s32.totalorder %s26_s26, 4   ;;  %s1170_s24 = sld [smem:[#allocation14_spill]] }
  0xd8   : > { %s1171_s25 = sld [smem:[#allocation16_spill]]  ;;  %s1172_s21 = smov %s914_s22 }
  0xd9   : > { %s1173_s22 = smov %s918_s23  ;;  %25 = sbr.rel (!%p23_p10) target bundleno = 11 (0xb), region = 113 }
  0xdc   : > { %s1174_s23 = smov %s1169_s16 }
  0xde   :  { %524 = vsyncpa [#allocation3], 1 }
  0xdf   :  { %526 = vsyncpa [#allocation3 + $0x1], 1 }
  0xe0   :  { %527 = vsyncpa [#allocation8], 1 }
  0xe1   :  { %529 = vsyncpa [#allocation8 + $0x1], 1 }
  0xe2   :  { %530 = vsyncpa [#allocation4], 1 }
  0xe3   :  { %532 = vsyncpa [#allocation4 + $0x1], 1 }
  0xe4   :  { %533 = vsyncpa [#allocation5], 1 }
  0xe5   :  { %535 = vsyncpa [#allocation5 + $0x1], 1 }

</bundles_post_ra>
